<compile_context>
chip_gen: v6e
topology: v6e:2x2x1
jax: 0.10.0
libtpu: 0.0.40
codegen_flags: <defaults>
</compile_context>

<pallas_src>
import functools

import jax
import jax.numpy as jnp
from jax.experimental import pallas as pl
from jax.experimental.pallas import tpu as pltpu

# ---- static module hyper-parameters (synthetic, from StackCNN.__init__) ----
LAYER_NUM = 3
IN_CHANNELS = 4
OUT_CHANNELS = 32
KERNEL_SIZE = 3
STRIDE = 1            # module default / only value used here
PADDING = 1           # "same"-style padding (see Conv1dReLU docstring)

BATCH = 2
SEQ_LEN = 16


def stackcnn_kernel(x_ref, w0_ref, b0_ref, wr_ref, br_ref, o_ref, hbuf,
                    *, layer_num, pad, seq_len, kernel_size):
    # x_ref : (N, L + 2*pad, Cin)          -- already padded + NLC-transposed in the wrapper
    # w0_ref: (K*Cin,  Cout)               b0_ref: (1, Cout)
    # wr_ref: (layer_num-1, K*Cout, Cout)  br_ref: (layer_num-1, 1, Cout)
    # o_ref : (N, Cout)
    # hbuf  : VMEM scratch (N, L + 2*pad, Cout) -- persistent padded activations
    N = x_ref.shape[0]
    L = seq_len
    K = kernel_size
    Cout = o_ref.shape[-1]

    def im2col(hp):
        # hp: (N, L + 2*pad, C) -> (N*L, K*C); tap k reads rows [k : k+L].
        cols = jnp.concatenate([hp[:, k:k + L, :] for k in range(K)], axis=-1)
        return cols.reshape(N * L, K * hp.shape[-1])

    # ---- conv_layer0: one matmul over the im2col'd (pre-padded) input ----
    h = jnp.dot(im2col(x_ref[...]), w0_ref[...],
                preferred_element_type=jnp.float32)
    h = jnp.maximum(h + b0_ref[...], 0.0)                    # (N*L, Cout)

    # Zero the padded activation buffer once; later layers only write the interior rows,
    # so the `pad` boundary rows stay zero (per-sequence zero padding, no cross-sample mix).
    hbuf[...] = jnp.zeros_like(hbuf)

    # ---- conv_layer1 .. conv_layer{layer_num-1} ----
    for i in range(layer_num - 1):
        hbuf[:, pad:pad + L, :] = h.reshape(N, L, Cout)
        h = jnp.dot(im2col(hbuf[...]), wr_ref[i],
                    preferred_element_type=jnp.float32)
        h = jnp.maximum(h + br_ref[i], 0.0)                  # (N*L, Cout)

    # ---- AdaptiveMaxPool1d(1) + squeeze(-1): global max over the length axis ----
    o_ref[...] = jnp.max(h.reshape(N, L, Cout), axis=1)      # (N, Cout), lane-dense store


def stackcnn_forward(x_ncw, w0, b0, wr, br, *, layer_num=LAYER_NUM,
                     pad=PADDING, kernel_size=KERNEL_SIZE):
    """x_ncw: (N, C_in, L) like PyTorch.  Returns (N, C_out)."""
    N, Cin, L = x_ncw.shape
    K = kernel_size
    Cout = w0.shape[-1]
    Lp = L + 2 * pad

    # NCW -> NLC transpose fused with the layer-0 zero padding (single XLA layout op),
    # so the kernel never calls jnp.pad.
    x_nlc = jnp.transpose(x_ncw, (0, 2, 1))
    xp = jnp.pad(x_nlc, ((0, 0), (pad, pad), (0, 0)))

    # Flatten the conv taps so each layer is a single MXU matmul:
    # (K, Ci, Co) -> (K*Ci, Co); flattened channel index = k*Ci + c matches im2col order.
    w0f = w0.reshape(K * Cin, Cout)
    wrf = wr.reshape(layer_num - 1, K * Cout, Cout)

    kern = functools.partial(stackcnn_kernel, layer_num=layer_num, pad=pad,
                             seq_len=L, kernel_size=K)

    flops = 2 * N * L * K * Cout * (Cin + (layer_num - 1) * Cout)
    bytes_accessed = 4 * (xp.size + w0f.size + b0.size + wrf.size + br.size + N * Cout)

    out = pl.pallas_call(
        kern,
        out_shape=jax.ShapeDtypeStruct((N, Cout), jnp.float32),
        grid_spec=pltpu.PrefetchScalarGridSpec(
            num_scalar_prefetch=0,
            grid=(1,),                       # whole (tiny) batch in one step
            in_specs=[
                pl.BlockSpec((N, Lp, Cin), lambda i: (0, 0, 0)),
                pl.BlockSpec((K * Cin, Cout), lambda i: (0, 0)),
                pl.BlockSpec((1, Cout), lambda i: (0, 0)),
                pl.BlockSpec((layer_num - 1, K * Cout, Cout),
                             lambda i: (0, 0, 0)),
                pl.BlockSpec((layer_num - 1, 1, Cout), lambda i: (0, 0, 0)),
            ],
            out_specs=pl.BlockSpec((N, Cout), lambda i: (0, 0)),
            scratch_shapes=[pltpu.VMEM((N, Lp, Cout), jnp.float32)],
        ),
        compiler_params=pltpu.CompilerParams(
            dimension_semantics=("arbitrary",)),
        cost_estimate=pl.CostEstimate(flops=flops, transcendentals=0,
                                      bytes_accessed=bytes_accessed),
    )(xp, w0f, b0, wrf, br)
    return out


def reference_forward(x_ncw, w0, b0, wr, br, pad):
    """Pure-JAX reference mirroring the PyTorch forward (for validation)."""
    h = jnp.transpose(x_ncw, (0, 2, 1))  # NLC

    def conv(h, w, b):
        out = jax.lax.conv_general_dilated(
            h, w, window_strides=(1,), padding=[(pad, pad)],
            dimension_numbers=("NWC", "WIO", "NWC"))
        return jnp.maximum(out + b.reshape(1, 1, -1), 0.0)

    h = conv(h, w0, b0)
    for i in range(wr.shape[0]):
        h = conv(h, wr[i], br[i])
    return jnp.max(h, axis=1)  # (N, Cout)


if __name__ == "__main__":
    key = jax.random.PRNGKey(0)
    kx, kw0, kb0, kwr, kbr = jax.random.split(key, 5)

    # input in PyTorch NCW convention
    x = jax.random.normal(kx, (BATCH, IN_CHANNELS, SEQ_LEN), jnp.float32)

    # deterministic synthetic parameters (stored as (K, Cin, Cout) / (1, Cout))
    w0 = 0.1 * jax.random.normal(
        kw0, (KERNEL_SIZE, IN_CHANNELS, OUT_CHANNELS), jnp.float32)
    b0 = 0.1 * jax.random.normal(kb0, (1, OUT_CHANNELS), jnp.float32)
    wr = 0.1 * jax.random.normal(
        kwr, (LAYER_NUM - 1, KERNEL_SIZE, OUT_CHANNELS, OUT_CHANNELS),
        jnp.float32)
    br = 0.1 * jax.random.normal(
        kbr, (LAYER_NUM - 1, 1, OUT_CHANNELS), jnp.float32)

    out = stackcnn_forward(x, w0, b0, wr, br)
    out = jax.block_until_ready(out)

    ref = reference_forward(x, w0, b0, wr, br, PADDING)
    assert out.shape == (BATCH, OUT_CHANNELS), out.shape
    assert jnp.allclose(out, ref, atol=1e-4, rtol=1e-4), "mismatch vs reference"

    print("KERNEL_OK")
</pallas_src>

<mosaic_0001>
module attributes {stable_mosaic.version = 11 : i64} {
  func.func @stackcnn_kernel(%arg0: i32, %arg1: memref<2x18x4xf32, #tpu.memory_space<vmem>>, %arg2: memref<12x32xf32, #tpu.memory_space<vmem>>, %arg3: memref<1x32xf32, #tpu.memory_space<vmem>>, %arg4: memref<2x96x32xf32, #tpu.memory_space<vmem>>, %arg5: memref<2x1x32xf32, #tpu.memory_space<vmem>>, %arg6: memref<2x32xf32, #tpu.memory_space<vmem>>, %arg7: memref<2x18x32xf32, #tpu.memory_space<vmem>>) attributes {dimension_semantics = [#tpu.dimension_semantics<arbitrary>], iteration_bounds = array<i64: 1>, scalar_prefetch = 0 : i64, scratch_operands = 1 : i64, tpu.core_type = #tpu.core_type<tc>, window_params = [{pipeline_mode = #tpu.pipeline_mode<synchronous>, transform_indices = @transform_0, window_bounds = array<i64: 2, 18, 4>}, {pipeline_mode = #tpu.pipeline_mode<synchronous>, transform_indices = @transform_1, window_bounds = array<i64: 12, 32>}, {pipeline_mode = #tpu.pipeline_mode<synchronous>, transform_indices = @transform_2, window_bounds = array<i64: 1, 32>}, {pipeline_mode = #tpu.pipeline_mode<synchronous>, transform_indices = @transform_3, window_bounds = array<i64: 2, 96, 32>}, {pipeline_mode = #tpu.pipeline_mode<synchronous>, transform_indices = @transform_4, window_bounds = array<i64: 2, 1, 32>}, {pipeline_mode = #tpu.pipeline_mode<synchronous>, transform_indices = @transform_5, window_bounds = array<i64: 2, 32>}]} {
    %c0 = arith.constant 0 : index
    %c0_0 = arith.constant 0 : index
    %c0_1 = arith.constant 0 : index
    %0 = vector.load %arg1[%c0, %c0_0, %c0_1] : memref<2x18x4xf32, #tpu.memory_space<vmem>>, vector<2x18x4xf32>
    %1 = vector.extract_strided_slice %0 {offsets = [0, 0, 0], sizes = [2, 16, 4], strides = [1, 1, 1]} : vector<2x18x4xf32> to vector<2x16x4xf32>
    %2 = vector.extract_strided_slice %0 {offsets = [0, 1, 0], sizes = [2, 16, 4], strides = [1, 1, 1]} : vector<2x18x4xf32> to vector<2x16x4xf32>
    %3 = vector.extract_strided_slice %0 {offsets = [0, 2, 0], sizes = [2, 16, 4], strides = [1, 1, 1]} : vector<2x18x4xf32> to vector<2x16x4xf32>
    %4 = tpu.concatenate %1, %2, %3 in 2 : vector<2x16x4xf32>, vector<2x16x4xf32>, vector<2x16x4xf32> -> vector<2x16x12xf32>
    %5 = vector.shape_cast %4 : vector<2x16x12xf32> to vector<32x12xf32>
    %c0_2 = arith.constant 0 : index
    %c0_3 = arith.constant 0 : index
    %6 = vector.load %arg2[%c0_2, %c0_3] : memref<12x32xf32, #tpu.memory_space<vmem>>, vector<12x32xf32>
    %cst = arith.constant dense<0.000000e+00> : vector<32x32xf32>
    %7 = tpu.matmul %5, %6, %cst {dimension_numbers = #tpu.dot_dimension_numbers<[1], [0], [0], [1], [0, 0, 1, 1], [], []>} : vector<32x12xf32>, vector<12x32xf32>, vector<32x32xf32> -> vector<32x32xf32>
    %c0_4 = arith.constant 0 : index
    %c0_5 = arith.constant 0 : index
    %8 = vector.load %arg3[%c0_4, %c0_5] : memref<1x32xf32, #tpu.memory_space<vmem>>, vector<1x32xf32>
    %9 = vector.broadcast %8 : vector<1x32xf32> to vector<32x32xf32>
    %10 = arith.addf %7, %9 : vector<32x32xf32>
    %cst_6 = arith.constant 0.000000e+00 : f32
    %11 = vector.broadcast %cst_6 : f32 to vector<32x32xf32>
    %12 = arith.maximumf %10, %11 : vector<32x32xf32>
    %cst_7 = arith.constant 0.000000e+00 : f32
    %13 = vector.broadcast %cst_7 : f32 to vector<2x18x32xf32>
    %c0_8 = arith.constant 0 : index
    %c0_9 = arith.constant 0 : index
    %c0_10 = arith.constant 0 : index
    %14 = vector.load %arg7[%c0_8, %c0_9, %c0_10] : memref<2x18x32xf32, #tpu.memory_space<vmem>>, vector<2x18x32xf32>
    tpu.vector_store %arg7[%c0_8, %c0_9, %c0_10], %13 {strides = array<i32>} : memref<2x18x32xf32, #tpu.memory_space<vmem>>, vector<2x18x32xf32>,
    %15 = vector.shape_cast %12 : vector<32x32xf32> to vector<2x16x32xf32>
    %c0_11 = arith.constant 0 : index
    %c1 = arith.constant 1 : index
    %c0_12 = arith.constant 0 : index
    %16 = vector.load %arg7[%c0_11, %c1, %c0_12] : memref<2x18x32xf32, #tpu.memory_space<vmem>>, vector<2x16x32xf32>
    tpu.vector_store %arg7[%c0_11, %c1, %c0_12], %15 {strides = array<i32>} : memref<2x18x32xf32, #tpu.memory_space<vmem>>, vector<2x16x32xf32>,
    %c0_13 = arith.constant 0 : index
    %c0_14 = arith.constant 0 : index
    %c0_15 = arith.constant 0 : index
    %17 = vector.load %arg7[%c0_13, %c0_14, %c0_15] : memref<2x18x32xf32, #tpu.memory_space<vmem>>, vector<2x18x32xf32>
    %18 = vector.extract_strided_slice %17 {offsets = [0, 0, 0], sizes = [2, 16, 32], strides = [1, 1, 1]} : vector<2x18x32xf32> to vector<2x16x32xf32>
    %19 = vector.extract_strided_slice %17 {offsets = [0, 1, 0], sizes = [2, 16, 32], strides = [1, 1, 1]} : vector<2x18x32xf32> to vector<2x16x32xf32>
    %20 = vector.extract_strided_slice %17 {offsets = [0, 2, 0], sizes = [2, 16, 32], strides = [1, 1, 1]} : vector<2x18x32xf32> to vector<2x16x32xf32>
    %21 = tpu.concatenate %18, %19, %20 in 2 : vector<2x16x32xf32>, vector<2x16x32xf32>, vector<2x16x32xf32> -> vector<2x16x96xf32>
    %22 = vector.shape_cast %21 : vector<2x16x96xf32> to vector<32x96xf32>
    %c0_16 = arith.constant 0 : index
    %c0_17 = arith.constant 0 : index
    %c0_18 = arith.constant 0 : index
    %23 = vector.load %arg4[%c0_16, %c0_17, %c0_18] : memref<2x96x32xf32, #tpu.memory_space<vmem>>, vector<1x96x32xf32>
    %24 = vector.shape_cast %23 : vector<1x96x32xf32> to vector<96x32xf32>
    %cst_19 = arith.constant dense<0.000000e+00> : vector<32x32xf32>
    %25 = tpu.matmul %22, %24, %cst_19 {dimension_numbers = #tpu.dot_dimension_numbers<[1], [0], [0], [1], [0, 0, 1, 1], [], []>} : vector<32x96xf32>, vector<96x32xf32>, vector<32x32xf32> -> vector<32x32xf32>
    %c0_20 = arith.constant 0 : index
    %c0_21 = arith.constant 0 : index
    %c0_22 = arith.constant 0 : index
    %26 = vector.load %arg5[%c0_20, %c0_21, %c0_22] : memref<2x1x32xf32, #tpu.memory_space<vmem>>, vector<1x1x32xf32>
    %27 = vector.shape_cast %26 : vector<1x1x32xf32> to vector<1x32xf32>
    %28 = vector.broadcast %27 : vector<1x32xf32> to vector<32x32xf32>
    %29 = arith.addf %25, %28 : vector<32x32xf32>
    %cst_23 = arith.constant 0.000000e+00 : f32
    %30 = vector.broadcast %cst_23 : f32 to vector<32x32xf32>
    %31 = arith.maximumf %29, %30 : vector<32x32xf32>
    %32 = vector.shape_cast %31 : vector<32x32xf32> to vector<2x16x32xf32>
    %c0_24 = arith.constant 0 : index
    %c1_25 = arith.constant 1 : index
    %c0_26 = arith.constant 0 : index
    %33 = vector.load %arg7[%c0_24, %c1_25, %c0_26] : memref<2x18x32xf32, #tpu.memory_space<vmem>>, vector<2x16x32xf32>
    tpu.vector_store %arg7[%c0_24, %c1_25, %c0_26], %32 {strides = array<i32>} : memref<2x18x32xf32, #tpu.memory_space<vmem>>, vector<2x16x32xf32>,
    %c0_27 = arith.constant 0 : index
    %c0_28 = arith.constant 0 : index
    %c0_29 = arith.constant 0 : index
    %34 = vector.load %arg7[%c0_27, %c0_28, %c0_29] : memref<2x18x32xf32, #tpu.memory_space<vmem>>, vector<2x18x32xf32>
    %35 = vector.extract_strided_slice %34 {offsets = [0, 0, 0], sizes = [2, 16, 32], strides = [1, 1, 1]} : vector<2x18x32xf32> to vector<2x16x32xf32>
    %36 = vector.extract_strided_slice %34 {offsets = [0, 1, 0], sizes = [2, 16, 32], strides = [1, 1, 1]} : vector<2x18x32xf32> to vector<2x16x32xf32>
    %37 = vector.extract_strided_slice %34 {offsets = [0, 2, 0], sizes = [2, 16, 32], strides = [1, 1, 1]} : vector<2x18x32xf32> to vector<2x16x32xf32>
    %38 = tpu.concatenate %35, %36, %37 in 2 : vector<2x16x32xf32>, vector<2x16x32xf32>, vector<2x16x32xf32> -> vector<2x16x96xf32>
    %39 = vector.shape_cast %38 : vector<2x16x96xf32> to vector<32x96xf32>
    %c1_30 = arith.constant 1 : index
    %c0_31 = arith.constant 0 : index
    %c0_32 = arith.constant 0 : index
    %40 = vector.load %arg4[%c1_30, %c0_31, %c0_32] : memref<2x96x32xf32, #tpu.memory_space<vmem>>, vector<1x96x32xf32>
    %41 = vector.shape_cast %40 : vector<1x96x32xf32> to vector<96x32xf32>
    %cst_33 = arith.constant dense<0.000000e+00> : vector<32x32xf32>
    %42 = tpu.matmul %39, %41, %cst_33 {dimension_numbers = #tpu.dot_dimension_numbers<[1], [0], [0], [1], [0, 0, 1, 1], [], []>} : vector<32x96xf32>, vector<96x32xf32>, vector<32x32xf32> -> vector<32x32xf32>
    %c1_34 = arith.constant 1 : index
    %c0_35 = arith.constant 0 : index
    %c0_36 = arith.constant 0 : index
    %43 = vector.load %arg5[%c1_34, %c0_35, %c0_36] : memref<2x1x32xf32, #tpu.memory_space<vmem>>, vector<1x1x32xf32>
    %44 = vector.shape_cast %43 : vector<1x1x32xf32> to vector<1x32xf32>
    %45 = vector.broadcast %44 : vector<1x32xf32> to vector<32x32xf32>
    %46 = arith.addf %42, %45 : vector<32x32xf32>
    %cst_37 = arith.constant 0.000000e+00 : f32
    %47 = vector.broadcast %cst_37 : f32 to vector<32x32xf32>
    %48 = arith.maximumf %46, %47 : vector<32x32xf32>
    %49 = vector.shape_cast %48 : vector<32x32xf32> to vector<2x16x32xf32>
    %cst_38 = arith.constant dense<0xFF800000> : vector<2x32xf32>
    %50 = vector.multi_reduction <maximumf>, %49, %cst_38 [1] : vector<2x16x32xf32> to vector<2x32xf32>
    %c0_39 = arith.constant 0 : index
    %c0_40 = arith.constant 0 : index
    %51 = vector.load %arg6[%c0_39, %c0_40] : memref<2x32xf32, #tpu.memory_space<vmem>>, vector<2x32xf32>
    tpu.vector_store %arg6[%c0_39, %c0_40], %50 {strides = array<i32>} : memref<2x32xf32, #tpu.memory_space<vmem>>, vector<2x32xf32>,
    return
  }
  func.func @transform_0(%arg0: i32) -> (i32, i32, i32) {
    %c0_i32 = arith.constant 0 : i32
    %c0_i32_0 = arith.constant 0 : i32
    %c0_i32_1 = arith.constant 0 : i32
    %c0_i32_2 = arith.constant 0 : i32
    return %c0_i32, %c0_i32_0, %c0_i32_1 : i32, i32, i32
  }
  func.func @transform_1(%arg0: i32) -> (i32, i32) {
    %c0_i32 = arith.constant 0 : i32
    %c0_i32_0 = arith.constant 0 : i32
    %c0_i32_1 = arith.constant 0 : i32
    return %c0_i32, %c0_i32_0 : i32, i32
  }
  func.func @transform_2(%arg0: i32) -> (i32, i32) {
    %c0_i32 = arith.constant 0 : i32
    %c0_i32_0 = arith.constant 0 : i32
    %c0_i32_1 = arith.constant 0 : i32
    return %c0_i32, %c0_i32_0 : i32, i32
  }
  func.func @transform_3(%arg0: i32) -> (i32, i32, i32) {
    %c0_i32 = arith.constant 0 : i32
    %c0_i32_0 = arith.constant 0 : i32
    %c0_i32_1 = arith.constant 0 : i32
    %c0_i32_2 = arith.constant 0 : i32
    return %c0_i32, %c0_i32_0, %c0_i32_1 : i32, i32, i32
  }
  func.func @transform_4(%arg0: i32) -> (i32, i32, i32) {
    %c0_i32 = arith.constant 0 : i32
    %c0_i32_0 = arith.constant 0 : i32
    %c0_i32_1 = arith.constant 0 : i32
    %c0_i32_2 = arith.constant 0 : i32
    return %c0_i32, %c0_i32_0, %c0_i32_1 : i32, i32, i32
  }
  func.func @transform_5(%arg0: i32) -> (i32, i32) {
    %c0_i32 = arith.constant 0 : i32
    %c0_i32_0 = arith.constant 0 : i32
    %c0_i32_1 = arith.constant 0 : i32
    return %c0_i32, %c0_i32_0 : i32, i32
  }
}

</mosaic_0001>

<bundles_post_ra>
// kernel: tpu_custom_call.1
= control target key start
LH: loop header
LB: loop body
LE: loop exit
PB: predicated region body
PF: predicated region fallthrough
CT: control target
= control target key end

     0   :  { %vm56_vm0 = vcmask 1045504   ;;  %vm33_vm1 = vcmask 1046528   ;;  %s795_s30 = smov 8   ;;  %s796_s6 = smov 4   ;;  %s1034_s0 = inlined_call_operand.vmem [shape: f32[2,18,4], index: 0, kind: input, shape index: {}]   ;;  %s1035_s1 = inlined_call_operand.vmem [shape: f32[12,32], index: 1, kind: input, shape index: {}]   ;;  %s1036_s2 = inlined_call_operand.vmem [shape: f32[1,32], index: 2, kind: input, shape index: {}]   ;;  %s1037_s3 = inlined_call_operand.vmem [shape: f32[2,96,32], index: 3, kind: input, shape index: {}]   ;;  %s1038_s4 = inlined_call_operand.vmem [shape: f32[2,1,32], index: 4, kind: input, shape index: {}]   ;;  %s1039_s5 = inlined_call_operand.hbm [shape: f32[2,32], index: 5, kind: output, shape index: {}]  }
   0x1   :  { %v21_v0 = vld [vmem:[%s1034_s0] sm:$0xff]  ;;  %v22_v1 = vld [vmem:[%s1034_s0 + $0x8] sm:$0xff]  ;;  %v23_v6 = vld [vmem:[%s1034_s0 + $0x10] sm:$0x3] }
   0x2   :  { %v57_v2 = vrot.slane %v21_v0, 2  ;;  %v58_v3 = vrot.slane %v22_v1, 2  ;;  %v34_v4 = vrot.slane %v21_v0, 1  ;;  %v35_v5 = vrot.slane %v22_v1, 1  ;;  %v25_v9 = vld [vmem:[%s1034_s0 + $0x20] sm:$0xff]  ;;  %v24_v11 = vld [vmem:[%s1034_s0 + $0x18] sm:$0xff] }
   0x3   :  { %v60_v7 = vrot.slane %v23_v6, 2  ;;  %v37_v8 = vrot.slane %v23_v6, 1  ;;  %v26_v10 = vld [vmem:[%s1034_s0 + $0x28] sm:$0x3]  ;;  %v40_v14 = vrot.slane %v25_v9, 1 }
   0x4   :  { %v59_v12 = vsel %vm56_vm0, %v57_v2, %v58_v3  ;;  %v36_v13 = vsel %vm33_vm1, %v34_v4, %v35_v5  ;;  %v90_v15 = vld [vmem:[%s1035_s1 + $0x8] sm:$0xf] }
   0x5   :  { %67 = vrot.lane.b32.xlu1 %v59_v12, %s795_s30  ;;  %44 = vrot.lane.b32.xlu0 %v36_v13, %s796_s6 }
   0x6   :  { %10 = vsyncpa [#allocation4], 0  ;;  %v61_v16 = vsel %vm56_vm0, %v58_v3, %v60_v7  ;;  %v38_v17 = vsel %vm33_vm1, %v35_v5, %v37_v8  ;;  %v42_v18 = vrot.slane %v26_v10, 1  ;;  %v39_v19 = vrot.slane %v24_v11, 1  ;;  %v89_v20 = vld [vmem:[%s1035_s1] sm:$0xff]  ;;  %v292_v45 = vld [vmem:[%s1037_s3 + $0x58] sm:$0xff] }
   0x7   :  { %vm111_vm2 = vcmask 1043456   ;;  %v63_v21 = vrot.slane %v25_v9, 2  ;;  %v65_v24 = vrot.slane %v26_v10, 2  ;;  %v62_v25 = vrot.slane %v24_v11, 2  ;;  %v291_v46 = vld [vmem:[%s1037_s3 + $0x50] sm:$0xff]  ;;  %707 = vmatprep.subr.mxu1 %v292_v45  ;;  %v290_v47 = vld [vmem:[%s1037_s3 + $0x48] sm:$0xff] }
   0x8   :  { %697 = vmatprep.subr.msk.mxu0 %vm111_vm2, %v90_v15  ;;  %v43_v22 = vsel %vm33_vm1, %v40_v14, %v42_v18  ;;  %v41_v23 = vsel %vm33_vm1, %v39_v19, %v40_v14  ;;  %vm79_vm3 = vcmask 31744   ;;  %vm84_vm4 = vcmask 64512   ;;  %708 = vmatpush3.msra.mxu1 %v292_v45  ;;  %v289_v48 = vld [vmem:[%s1037_s3 + $0x40] sm:$0xff]  ;;  %v288_v49 = vld [vmem:[%s1037_s3 + $0x38] sm:$0xff]  ;;  %v287_v50 = vld [vmem:[%s1037_s3 + $0x30] sm:$0xff]  ;;  %s798_s0 = smov 32  }
   0x9   :  { %69 = vrot.lane.b32.xlu1 %v61_v16, %s795_s30  ;;  %46 = vrot.lane.b32.xlu0 %v38_v17, %s796_s6  ;;  %v66_v26 = vsel %vm56_vm0, %v63_v21, %v65_v24  ;;  %v64_v27 = vsel %vm56_vm0, %v62_v25, %v63_v21  ;;  %vm98_vm5 = vcmask 97280   ;;  %vm204_vm6 = vcmask 261120   ;;  %v286_v51 = vld [vmem:[%s1037_s3 + $0x28] sm:$0xff]  ;;  %v285_v52 = vld [vmem:[%s1037_s3 + $0x20] sm:$0xff]  ;;  %s799_s9 = smov 64  }
   0xa   :  { %698 = vmatpush3.msk.msra.mxu0 %vm111_vm2, %v90_v15  ;;  %vm207_vm7 = vcmask 254976   ;;  %v797_v44 = vmov 0.0   ;;  %709 = vmatprep.subr.mxu1 %v291_v46  ;;  %v284_v53 = vld [vmem:[%s1037_s3 + $0x18] sm:$0xff]  ;;  %v630_v54 = vld [vmem:[%s1036_s2] ss:$0 sm:$0xff]  ;;  %v283_v60 = vld [vmem:[%s1037_s3 + $0x10] sm:$0xff] }
   0xb   :  { %699 = vmatprep.subr.mxu0 %v89_v20  ;;  %206 = vst.msk [vmem:[#allocation2 + $0x8] sm:$0xff] %vm204_vm6, %v797_v44  ;;  %205 = vst.msk [vmem:[#allocation2] sm:$0xff] %vm204_vm6, %v797_v44  ;;  %710 = vmatpush3.msra.mxu1 %v291_v46  ;;  %v282_v62 = vld [vmem:[%s1037_s3 + $0x8] sm:$0xff]  ;;  %vm276_vm8 = vcmask 523264   ;;  %vm300_vm9 = vcmask 785408   ;;  %vm612_vm10 = vcmask 1041409  }
   0xc   :  { %700 = vmatpush3.msra.mxu0 %v89_v20  ;;  %208 = vst.msk [vmem:[#allocation2 + $0x10] sm:$0x3] %vm207_vm7, %v797_v44  ;;  %211 = vst.msk [vmem:[#allocation2 + $0x28] sm:$0x3] %vm207_vm7, %v797_v44  ;;  %711 = vmatprep.subr.mxu1 %v290_v47 }
   0xd   :  { %50 = vrot.lane.b32.xlu1 %v43_v22, %s796_s6  ;;  %48 = vrot.lane.b32.xlu0 %v41_v23, %s796_s6  ;;  %209 = vst.msk [vmem:[#allocation2 + $0x18] sm:$0xff] %vm204_vm6, %v797_v44  ;;  %210 = vst.msk [vmem:[#allocation2 + $0x20] sm:$0xff] %vm204_vm6, %v797_v44 }
   0xe   :  { %712 = vmatpush3.msra.mxu1 %v290_v47 }
   0xf   :  { %713 = vmatprep.subr.mxu1 %v289_v48 }
  0x10   :  { %714 = vmatpush3.msra.mxu1 %v289_v48  ;;  %v652_v48 = vld [vmem:[%s1037_s3 + $0xb8] sm:$0xff] }
  0x11   :  { %73 = vrot.lane.b32.xlu1 %v66_v26, %s795_s30  ;;  %71 = vrot.lane.b32.xlu0 %v64_v27, %s795_s30 }
  0x12   :  { %715 = vmatprep.subr.mxu1 %v288_v49  ;;  %737 = vmatprep.subr.mxu0 %v652_v48 }
  0x13   :  { %716 = vmatpush3.msra.mxu1 %v288_v49  ;;  %v651_v49 = vld [vmem:[%s1037_s3 + $0xb0] sm:$0xff] }
  0x14   :  { %717 = vmatprep.subr.mxu1 %v287_v50 }
  0x15   :  { %718 = vmatpush3.msra.mxu1 %v287_v50  ;;  %v650_v50 = vld [vmem:[%s1037_s3 + $0xa8] sm:$0xff] }
  0x16   :  { %719 = vmatprep.subr.mxu1 %v286_v51 }
  0x17   :  { %720 = vmatpush3.msra.mxu1 %v286_v51  ;;  %v649_v51 = vld [vmem:[%s1037_s3 + $0xa0] sm:$0xff] }
  0x18   :  { %721 = vmatprep.subr.mxu1 %v285_v52 }
  0x19   :  { %722 = vmatpush3.msra.mxu1 %v285_v52  ;;  %v648_v52 = vld [vmem:[%s1037_s3 + $0x98] sm:$0xff] }
  0x1a   :  { %723 = vmatprep.subr.mxu1 %v284_v53 }
  0x1b   :  { %724 = vmatpush3.msra.mxu1 %v284_v53  ;;  %v647_v53 = vld [vmem:[%s1037_s3 + $0x90] sm:$0xff] }
  0x1c   :  { %725 = vmatprep.subr.mxu1 %v283_v60 }
  0x1d   :  { %726 = vmatpush3.msra.mxu1 %v283_v60 }
  0x1e   :  { %727 = vmatprep.subr.mxu1 %v282_v62 }
  0x1f   :  { %728 = vmatpush3.msra.mxu1 %v282_v62 }
  0x77   :  { %v68_v28 = vpop.permute.xlu1 %67  ;;  %v45_v29 = vpop.permute.xlu0 %44 }
  0x78   :  { %v80_v30 = vsel %vm79_vm3, %v21_v0, %v45_v29  ;;  %v281_v0 = vld [vmem:[%s1037_s3] sm:$0xff] }
  0x79   :  { %v85_v31 = vsel %vm84_vm4, %v80_v30, %v68_v28  ;;  %729 = vmatprep.subr.mxu1 %v281_v0 }
  0x7a   :  { %701 = vmatprep.mubr.msk.f32.mxu0 %vm98_vm5, %v85_v31  ;;  %730 = vmatpush3.msra.mxu1 %v281_v0 }
  0x7b   :  { %v70_v32 = vpop.permute.xlu1 %69  ;;  %v47_v33 = vpop.permute.xlu0 %46 }
  0x7c   :  { %v81_v34 = vsel %vm79_vm3, %v22_v1, %v47_v33 }
  0x7d   :  { %v86_v35 = vsel %vm84_vm4, %v81_v34, %v70_v32 }
  0x7e   :  { %702 = vmatmul.mubr.msk.f32.vlgmr.msra.gmra.mxu0 %vm98_vm5, %v86_v35 }
  0x7f   :  { %v51_v36 = vpop.permute.xlu1 %50  ;;  %v49_v37 = vpop.permute.xlu0 %48  ;;  %738 = vmatpush3.msra.mxu0 %v652_v48 }
  0x80   :  { %v83_v38 = vsel %vm79_vm3, %v25_v9, %v51_v36  ;;  %v82_v39 = vsel %vm79_vm3, %v24_v11, %v49_v37  ;;  %739 = vmatprep.subr.mxu0 %v651_v49 }
  0x81   :  { %740 = vmatpush3.msra.mxu0 %v651_v49 }
  0x82   :  { %741 = vmatprep.subr.mxu0 %v650_v50 }
  0x83   :  { %v74_v40 = vpop.permute.xlu1 %73  ;;  %v72_v41 = vpop.permute.xlu0 %71  ;;  %742 = vmatpush3.msra.mxu0 %v650_v50 }
  0x84   :  { %v88_v42 = vsel %vm84_vm4, %v83_v38, %v74_v40  ;;  %v87_v43 = vsel %vm84_vm4, %v82_v39, %v72_v41  ;;  %743 = vmatprep.subr.mxu0 %v649_v51 }
  0x85   :  { %704 = vmatprep.mubr.msk.f32.mxu0 %vm98_vm5, %v87_v43  ;;  %744 = vmatpush3.msra.mxu0 %v649_v51  ;;  %v654_v51 = vld [vmem:[%s1038_s4 + $0x1] ss:$0 sm:$0xff] }
  0x86   :  { %705 = vmatmul.mubr.msk.f32.gmra.mxu0 %vm98_vm5, %v88_v42  ;;  %745 = vmatprep.subr.mxu0 %v648_v52 }
  0x87   :  { %746 = vmatpush3.msra.mxu0 %v648_v52 }
  0x88   :  { %747 = vmatprep.subr.mxu0 %v647_v53 }
  0x89   :  { %748 = vmatpush3.msra.mxu0 %v647_v53 }
 0x13e   :  { %v703_v55 = vpop.f32.mrf.mxu0 }
 0x13f   :  { %v187_v56 = vadd.f32 %v703_v55, %v630_v54  ;;  %v645_v55 = vld [vmem:[%s1037_s3 + $0x80] sm:$0xff] }
 0x140   :  { %v181_v57 = vpop.f32.mrf.mxu0 }
 0x141   :  { %v201_v58 = vmax.f32 %v187_v56, 0.0  ;;  %v182_v59 = vadd.f32 %v630_v54, %v181_v57  ;;  %v644_v56 = vld [vmem:[%s1037_s3 + $0x78] sm:$0xff]  ;;  %v636_v57 = vld [vmem:[%s1038_s4] ss:$0 sm:$0xff]  ;;  %s800_s4 = smov [#allocation3]  }
 0x143   :  { %213 = vst.msk [vmem:[#allocation2 + $0x9] sm:$0xff] %vm204_vm6, %v201_v58  ;;  %v200_v61 = vmax.f32 %v182_v59, 0.0 }
 0x145   :  { %212 = vst.msk [vmem:[#allocation2 + $0x1] sm:$0xff] %vm204_vm6, %v200_v61 }
 0x146   :  { %v706_v63 = vpop.f32.mrf.mxu0 }
 0x147   :  { %v197_v1 = vadd.f32 %v706_v63, %v630_v54  ;;  %v643_v63 = vld [vmem:[%s1037_s3 + $0x70] sm:$0xff] }
 0x148   :  { %v191_v2 = vpop.f32.mrf.mxu0 }
 0x149   :  { %v203_v3 = vmax.f32 %v197_v1, 0.0  ;;  %v192_v4 = vadd.f32 %v630_v54, %v191_v2  ;;  %v646_v54 = vld [vmem:[%s1037_s3 + $0x88] sm:$0xff] }
 0x14a   :  { %v218_v5 = vld [vmem:[#allocation2 + $0x10] sm:$0x3]  ;;  %749 = vmatprep.subr.mxu0 %v646_v54  ;;  %v642_v1 = vld [vmem:[%s1037_s3 + $0x68] sm:$0xff] }
 0x14b   :  { %215 = vst.msk [vmem:[#allocation2 + $0x21] sm:$0xff] %vm204_vm6, %v203_v3  ;;  %v202_v6 = vmax.f32 %v192_v4, 0.0  ;;  %v231_v10 = vrot.slane %v218_v5, 1  ;;  %v253_v16 = vrot.slane %v218_v5, 2  ;;  %750 = vmatpush3.msra.mxu0 %v646_v54  ;;  %v641_v3 = vld [vmem:[%s1037_s3 + $0x60] sm:$0xff] }
 0x14c   :  { %v217_v7 = vld [vmem:[#allocation2 + $0x8] sm:$0xff]  ;;  %v216_v8 = vld [vmem:[#allocation2] sm:$0xff]  ;;  %751 = vmatprep.subr.mxu0 %v645_v55 }
 0x14d   :  { %214 = vst.msk [vmem:[#allocation2 + $0x19] sm:$0xff] %vm204_vm6, %v202_v6  ;;  %v229_v9 = vrot.slane %v217_v7, 1  ;;  %v228_v11 = vrot.slane %v216_v8, 1  ;;  %v251_v14 = vrot.slane %v217_v7, 2  ;;  %v250_v15 = vrot.slane %v216_v8, 2  ;;  %752 = vmatpush3.msra.mxu0 %v645_v55 }
 0x14e   :  { %753 = vmatprep.subr.mxu0 %v644_v56 }
 0x14f   :  { %v232_v12 = vsel %vm33_vm1, %v229_v9, %v231_v10  ;;  %v230_v13 = vsel %vm33_vm1, %v228_v11, %v229_v9  ;;  %v254_v18 = vsel %vm56_vm0, %v251_v14, %v253_v16  ;;  %v252_v19 = vsel %vm56_vm0, %v250_v15, %v251_v14  ;;  %754 = vmatpush3.msra.mxu0 %v644_v56 }
 0x150   :  { %240 = vrot.lane.b32.xlu1 %v232_v12, %s798_s0  ;;  %238 = vrot.lane.b32.xlu0 %v230_v13, %s798_s0 }
 0x151   :  { %755 = vmatprep.subr.mxu0 %v643_v63 }
 0x152   :  { %v221_v17 = vld [vmem:[#allocation2 + $0x28] sm:$0x3]  ;;  %756 = vmatpush3.msra.mxu0 %v643_v63 }
 0x153   :  { %v236_v23 = vrot.slane %v221_v17, 1  ;;  %v258_v29 = vrot.slane %v221_v17, 2  ;;  %757 = vmatprep.subr.mxu0 %v642_v1 }
 0x154   :  { %262 = vrot.lane.b32.xlu1 %v254_v18, %s799_s9  ;;  %260 = vrot.lane.b32.xlu0 %v252_v19, %s799_s9  ;;  %v220_v20 = vld [vmem:[#allocation2 + $0x20] sm:$0xff]  ;;  %v219_v21 = vld [vmem:[#allocation2 + $0x18] sm:$0xff] }
 0x155   :  { %v234_v22 = vrot.slane %v220_v20, 1  ;;  %v233_v24 = vrot.slane %v219_v21, 1  ;;  %v256_v27 = vrot.slane %v220_v20, 2  ;;  %v255_v28 = vrot.slane %v219_v21, 2  ;;  %758 = vmatpush3.msra.mxu0 %v642_v1 }
 0x156   :  { %759 = vmatprep.subr.mxu0 %v641_v3 }
 0x157   :  { %v237_v25 = vsel %vm33_vm1, %v234_v22, %v236_v23  ;;  %v235_v26 = vsel %vm33_vm1, %v233_v24, %v234_v22  ;;  %v259_v30 = vsel %vm56_vm0, %v256_v27, %v258_v29  ;;  %v257_v31 = vsel %vm56_vm0, %v255_v28, %v256_v27  ;;  %760 = vmatpush3.msra.mxu0 %v641_v3 }
 0x158   :  { %244 = vrot.lane.b32.xlu1 %v237_v25, %s798_s0  ;;  %242 = vrot.lane.b32.xlu0 %v235_v26, %s798_s0 }
 0x15c   :  { %266 = vrot.lane.b32.xlu1 %v259_v30, %s799_s9  ;;  %264 = vrot.lane.b32.xlu0 %v257_v31, %s799_s9 }
 0x1c2   :  { %v241_v32 = vpop.permute.xlu1 %240  ;;  %v239_v33 = vpop.permute.xlu0 %238 }
 0x1c3   :  { %v273_v34 = vsel %vm204_vm6, %v217_v7, %v241_v32  ;;  %v272_v35 = vsel %vm204_vm6, %v216_v8, %v239_v33 }
 0x1c6   :  { %v263_v36 = vpop.permute.xlu1 %262  ;;  %v261_v37 = vpop.permute.xlu0 %260 }
 0x1c7   :  { %v278_v38 = vsel %vm276_vm8, %v273_v34, %v263_v36  ;;  %v277_v39 = vsel %vm276_vm8, %v272_v35, %v261_v37 }
 0x1c8   :  { %731 = vmatprep.mubr.msk.f32.mxu1 %vm300_vm9, %v277_v39 }
 0x1c9   :  { %732 = vmatmul.mubr.msk.f32.vlgmr.msra.gmra.mxu1 %vm300_vm9, %v278_v38 }
 0x1ca   :  { %v245_v40 = vpop.permute.xlu1 %244  ;;  %v243_v41 = vpop.permute.xlu0 %242 }
 0x1cb   :  { %v275_v42 = vsel %vm204_vm6, %v220_v20, %v245_v40  ;;  %v274_v43 = vsel %vm204_vm6, %v219_v21, %v243_v41 }
 0x1ce   :  { %v267_v44 = vpop.permute.xlu1 %266  ;;  %v265_v45 = vpop.permute.xlu0 %264 }
 0x1cf   :  { %v280_v46 = vsel %vm276_vm8, %v275_v42, %v267_v44  ;;  %v279_v47 = vsel %vm276_vm8, %v274_v43, %v265_v45 }
 0x1d0   :  { %734 = vmatprep.mubr.msk.f32.mxu1 %vm300_vm9, %v279_v47 }
 0x1d1   :  { %735 = vmatmul.mubr.msk.f32.gmra.mxu1 %vm300_vm9, %v280_v46 }
 0x289   :  { %v733_v58 = vpop.f32.mrf.mxu1 }
 0x28a   :  { %v385_v59 = vadd.f32 %v733_v58, %v636_v57 }
 0x28b   :  { %v379_v60 = vpop.f32.mrf.mxu1 }
 0x28c   :  { %v399_v61 = vmax.f32 %v385_v59, 0.0  ;;  %v380_v62 = vadd.f32 %v636_v57, %v379_v60 }
 0x28e   :  { %403 = vst.msk [vmem:[#allocation2 + $0x9] sm:$0xff] %vm204_vm6, %v399_v61  ;;  %v398_v0 = vmax.f32 %v380_v62, 0.0 }
 0x290   :  { %402 = vst.msk [vmem:[#allocation2 + $0x1] sm:$0xff] %vm204_vm6, %v398_v0 }
 0x291   :  { %v736_v2 = vpop.f32.mrf.mxu1 }
 0x292   :  { %v395_v4 = vadd.f32 %v736_v2, %v636_v57 }
 0x293   :  { %v389_v5 = vpop.f32.mrf.mxu1 }
 0x294   :  { %v401_v6 = vmax.f32 %v395_v4, 0.0  ;;  %v390_v7 = vadd.f32 %v636_v57, %v389_v5 }
 0x295   :  { %v408_v8 = vld [vmem:[#allocation2 + $0x10] sm:$0x3] }
 0x296   :  { %405 = vst.msk [vmem:[#allocation2 + $0x21] sm:$0xff] %vm204_vm6, %v401_v6  ;;  %v400_v9 = vmax.f32 %v390_v7, 0.0  ;;  %v421_v13 = vrot.slane %v408_v8, 1  ;;  %v443_v19 = vrot.slane %v408_v8, 2 }
 0x297   :  { %v407_v10 = vld [vmem:[#allocation2 + $0x8] sm:$0xff]  ;;  %v406_v11 = vld [vmem:[#allocation2] sm:$0xff] }
 0x298   :  { %404 = vst.msk [vmem:[#allocation2 + $0x19] sm:$0xff] %vm204_vm6, %v400_v9  ;;  %v419_v12 = vrot.slane %v407_v10, 1  ;;  %v418_v14 = vrot.slane %v406_v11, 1  ;;  %v441_v17 = vrot.slane %v407_v10, 2  ;;  %v440_v18 = vrot.slane %v406_v11, 2 }
 0x29a   :  { %v422_v15 = vsel %vm33_vm1, %v419_v12, %v421_v13  ;;  %v420_v16 = vsel %vm33_vm1, %v418_v14, %v419_v12  ;;  %v444_v21 = vsel %vm56_vm0, %v441_v17, %v443_v19  ;;  %v442_v22 = vsel %vm56_vm0, %v440_v18, %v441_v17 }
 0x29b   :  { %430 = vrot.lane.b32.xlu1 %v422_v15, %s798_s0  ;;  %428 = vrot.lane.b32.xlu0 %v420_v16, %s798_s0 }
 0x29d   :  { %v411_v20 = vld [vmem:[#allocation2 + $0x28] sm:$0x3] }
 0x29e   :  { %v426_v26 = vrot.slane %v411_v20, 1  ;;  %v448_v32 = vrot.slane %v411_v20, 2 }
 0x29f   :  { %452 = vrot.lane.b32.xlu1 %v444_v21, %s799_s9  ;;  %450 = vrot.lane.b32.xlu0 %v442_v22, %s799_s9  ;;  %v410_v23 = vld [vmem:[#allocation2 + $0x20] sm:$0xff]  ;;  %v409_v24 = vld [vmem:[#allocation2 + $0x18] sm:$0xff] }
 0x2a0   :  { %v424_v25 = vrot.slane %v410_v23, 1  ;;  %v423_v27 = vrot.slane %v409_v24, 1  ;;  %v446_v30 = vrot.slane %v410_v23, 2  ;;  %v445_v31 = vrot.slane %v409_v24, 2 }
 0x2a2   :  { %v427_v28 = vsel %vm33_vm1, %v424_v25, %v426_v26  ;;  %v425_v29 = vsel %vm33_vm1, %v423_v27, %v424_v25  ;;  %v449_v33 = vsel %vm56_vm0, %v446_v30, %v448_v32  ;;  %v447_v34 = vsel %vm56_vm0, %v445_v31, %v446_v30 }
 0x2a3   :  { %434 = vrot.lane.b32.xlu1 %v427_v28, %s798_s0  ;;  %432 = vrot.lane.b32.xlu0 %v425_v29, %s798_s0 }
 0x2a7   :  { %456 = vrot.lane.b32.xlu1 %v449_v33, %s799_s9  ;;  %454 = vrot.lane.b32.xlu0 %v447_v34, %s799_s9  ;;  %s622_s9 = sshll.u32 %s800_s4, 4  ;;  %s623_s9 = int_to_ptr.vmem [resolvable:$true] %s622_s9 }
 0x2a8   :  { %s773_s1 = scalar_lea.vmem %s623_s9, 32  ;;  %p778_p1 = scmp.lt.s32.totalorder %s623_s9, %s623_s9 }
 0x2a9   :  { %p774_p0 = scmp.ne.s32.totalorder %s623_s9, %s773_s1  ;;  %p779_p2 = scmp.lt.s32.totalorder %s773_s1, %s773_s1 }
 0x2ab   :  { %p780_p3 = por %p779_p2, %p778_p1 }
 0x2ad   :  { %p781_p4 = pnand %p780_p3, %p774_p0 }
 0x30d   :  { %v431_v35 = vpop.permute.xlu1 %430  ;;  %v429_v36 = vpop.permute.xlu0 %428 }
 0x30e   :  { %v463_v37 = vsel %vm204_vm6, %v407_v10, %v431_v35  ;;  %v462_v38 = vsel %vm204_vm6, %v406_v11, %v429_v36 }
 0x311   :  { %v453_v39 = vpop.permute.xlu1 %452  ;;  %v451_v40 = vpop.permute.xlu0 %450 }
 0x312   :  { %v467_v41 = vsel %vm276_vm8, %v463_v37, %v453_v39  ;;  %v466_v42 = vsel %vm276_vm8, %v462_v38, %v451_v40 }
 0x313   :  { %761 = vmatprep.mubr.msk.f32.mxu0 %vm300_vm9, %v466_v42 }
 0x314   :  { %762 = vmatmul.mubr.msk.f32.vlgmr.msra.gmra.mxu0 %vm300_vm9, %v467_v41 }
 0x315   :  { %v435_v43 = vpop.permute.xlu1 %434  ;;  %v433_v44 = vpop.permute.xlu0 %432 }
 0x316   :  { %v465_v45 = vsel %vm204_vm6, %v410_v23, %v435_v43  ;;  %v464_v46 = vsel %vm204_vm6, %v409_v24, %v433_v44 }
 0x319   :  { %v457_v47 = vpop.permute.xlu1 %456  ;;  %v455_v48 = vpop.permute.xlu0 %454 }
 0x31a   :  { %v469_v49 = vsel %vm276_vm8, %v465_v45, %v457_v47  ;;  %v468_v50 = vsel %vm276_vm8, %v464_v46, %v455_v48 }
 0x31b   :  { %764 = vmatprep.mubr.msk.f32.mxu0 %vm300_vm9, %v468_v50 }
 0x31c   :  { %765 = vmatmul.mubr.msk.f32.gmra.mxu0 %vm300_vm9, %v469_v49 }
 0x3d4   :  { %v763_v52 = vpop.f32.mrf.mxu0 }
 0x3d5   :  { %v575_v53 = vadd.f32 %v763_v52, %v654_v51 }
 0x3d6   :  { %v569_v54 = vpop.f32.mrf.mxu0 }
 0x3d7   :  { %v589_v55 = vmax.f32 %v575_v53, 0.0  ;;  %v570_v56 = vadd.f32 %v654_v51, %v569_v54 }
 0x3d9   :  { %v588_v57 = vmax.f32 %v570_v56, 0.0  ;;  %v593_v58 = vsel %vm204_vm6, %v589_v55, -inf }
 0x3db   :  { %v592_v59 = vsel %vm204_vm6, %v588_v57, -inf }
 0x3dc   :  { %v594_v60 = vmax.f32 %v592_v59, %v593_v58  ;;  %v766_v61 = vpop.f32.mrf.mxu0 }
 0x3dd   :  { %v585_v62 = vadd.f32 %v766_v61, %v654_v51 }
 0x3de   :  { %v595_v63 = vrot.slane %v594_v60, 4  ;;  %v579_v0 = vpop.f32.mrf.mxu0 }
 0x3df   :  { %v591_v1 = vmax.f32 %v585_v62, 0.0  ;;  %v580_v2 = vadd.f32 %v654_v51, %v579_v0 }
 0x3e0   :  { %v596_v3 = vmax.f32 %v594_v60, %v595_v63 }
 0x3e1   :  { %v590_v4 = vmax.f32 %v580_v2, 0.0  ;;  %v602_v5 = vsel %vm204_vm6, %v591_v1, -inf }
 0x3e2   :  { %v597_v7 = vrot.slane %v596_v3, 2 }
 0x3e3   :  { %v601_v6 = vsel %vm204_vm6, %v590_v4, -inf }
 0x3e4   :  { %v603_v8 = vmax.f32 %v601_v6, %v602_v5  ;;  %v598_v10 = vmax.f32 %v596_v3, %v597_v7 }
 0x3e6   :  { %v604_v9 = vrot.slane %v603_v8, 4  ;;  %v599_v14 = vrot.slane %v598_v10, 1 }
 0x3e8   :  { %v605_v11 = vmax.f32 %v603_v8, %v604_v9  ;;  %v600_v16 = vmax.f32 %v598_v10, %v599_v14 }
 0x3ea   :  { %v606_v12 = vrot.slane %v605_v11, 2 }
 0x3ec   :  { %v607_v13 = vmax.f32 %v605_v11, %v606_v12 }
 0x3ee   :  { %v608_v15 = vrot.slane %v607_v13, 1 }
 0x3f0   :  { %v609_v17 = vmax.f32 %v607_v13, %v608_v15 }
 0x3f2   :  { %v613_v18 = vsel %vm612_vm10, %v609_v17, %v600_v16 }
 0x3f3   :  { %615 = vst.msk [vmem:[#allocation3] sm:$0x3] %vm207_vm7, %v613_v18 }
 0x3f4   :  { %784 = shalt.err (!%p781_p4)
}
 0x3f5   :  { %625 = dma.vmem_to_hbm [thread:$0]  %s623_s9, 32, %s1039_s5, [#allocation4]  }
 0x3f6   :  { %793 = dma.done.wait [#allocation4], 32  }
 0x3f7   :  { %794 = vsyncadd [#allocation4], 4294967264 }
 0x3f8   :  { %629 = vsyncpa [#allocation4], 1 }

</bundles_post_ra>
